<compile_context>
chip_gen: v5e
topology: v5e:2x2
jax: 0.10.0
libtpu: 0.0.40
codegen_flags: <defaults>
</compile_context>

<pallas_src>
import jax
import jax.numpy as jnp
from jax.experimental import pallas as pl
from jax.experimental.pallas import tpu as pltpu


def _epic_doc_quality_kernel(x_ref, w_ref, b_ref, o_ref):
    # x_ref: (bb, D) VMEM   w_ref: (D, 1) VMEM   b_ref: (1,) SMEM   o_ref: (bb, 1) VMEM
    s = jnp.dot(x_ref[...], w_ref[...], preferred_element_type=jnp.float32)  # (bb, 1)
    s = s + b_ref[0]                    # scalar bias from SMEM
    # Exact sigmoid (no approx reciprocal: ~2^-12 rel. error would hurt accuracy
    # and the divide over bb elements per multi-us tile is negligible).
    o_ref[...] = (1.0 / (1.0 + jnp.exp(-s))).astype(o_ref.dtype)


def _round_up(n, m):
    return -(-n // m) * m


def epic_doc_quality(x, weight, bias, *, block_b=2048):
    """sigmoid(x @ weight.T + bias); weight (1, D), bias (1,), like nn.Linear(D, 1)."""
    D = x.shape[-1]
    assert weight.shape == (1, D)
    assert bias.shape == (1,)

    lead = x.shape[:-1]
    x2 = x.reshape(-1, D)
    B = x2.shape[0]
    itemsize = x2.dtype.itemsize

    # --- tile sizing -------------------------------------------------------
    # Cap bb so the double-buffered x stream stays ~12 MiB regardless of D
    # (safe on v5e's 16 MiB scoped default and v7x's 64 MiB/TC physical VMEM).
    x_stream_budget = 12 * 1024 * 1024
    bb_cap = max(128, (x_stream_budget // (2 * D * itemsize)) // 128 * 128)
    bb = min(block_b, bb_cap, _round_up(B, 128))
    # Megacore balance (v7x): prefer >= 2 roughly equal grid steps.
    if B > 128:
        bb = min(bb, _round_up(-(-B // 2), 128))
    grid = (pl.cdiv(B, bb),)  # ragged last block: clamped reads, masked writes

    # Free layout plumbing: (1, D) -> (D, 1) so x never needs transposing; the
    # tiny weight is also cast to x's dtype so bf16 inputs stream as bf16.
    w_t = weight.reshape(D, 1).astype(x2.dtype)
    b = bias.astype(jnp.float32)

    out = pl.pallas_call(
        _epic_doc_quality_kernel,
        out_shape=jax.ShapeDtypeStruct((B, 1), x2.dtype),
        grid_spec=pltpu.PrefetchScalarGridSpec(
            num_scalar_prefetch=0,
            grid=grid,
            in_specs=[
                pl.BlockSpec((bb, D), lambda i: (i, 0)),            # streamed x tile
                pl.BlockSpec((D, 1), lambda i: (0, 0)),             # weight col (resident)
                pl.BlockSpec(memory_space=pltpu.MemorySpace.SMEM),  # bias scalar
            ],
            out_specs=pl.BlockSpec((bb, 1), lambda i: (i, 0)),
        ),
        compiler_params=pltpu.CompilerParams(
            dimension_semantics=("parallel",),
            vmem_limit_bytes=32 * 1024 * 1024,
        ),
    )(x2, w_t, b)

    return out.reshape(*lead, 1)


def epic_doc_quality_ref(x, weight, bias):
    return jax.nn.sigmoid(x @ weight.T + bias)


if __name__ == "__main__":
    key = jax.random.PRNGKey(0)
    kx, kw, kb = jax.random.split(key, 3)

    # Small shapes consistent with the module: a batch of [CLS] embeddings.
    B, D = 16, 32
    x = jax.random.normal(kx, (B, D), dtype=jnp.float32)

    # Deterministic synthetic params matching nn.Linear(D, 1): weight (1, D), bias (1,)
    bound = 1.0 / (D ** 0.5)
    weight = jax.random.uniform(kw, (1, D), jnp.float32, -bound, bound)
    bias = jax.random.uniform(kb, (1,), jnp.float32, -bound, bound)

    out = epic_doc_quality(x, weight, bias)
    out = jax.block_until_ready(out)
    ref = epic_doc_quality_ref(x, weight, bias)
    assert out.shape == (B, 1)
    assert jnp.allclose(out, ref, atol=1e-5, rtol=1e-5), "mismatch vs reference (small)"

    # Multi-step grid with a ragged last block (no wrapper-side padding).
    B2 = 300
    x2 = jax.random.normal(kx, (B2, D), dtype=jnp.float32)
    out2 = epic_doc_quality(x2, weight, bias, block_b=128)
    out2 = jax.block_until_ready(out2)
    ref2 = epic_doc_quality_ref(x2, weight, bias)
    assert out2.shape == (B2, 1)
    assert jnp.allclose(out2, ref2, atol=1e-5, rtol=1e-5), "mismatch vs reference (ragged)"

    # bf16 streaming path (HBM-bound kernel -> half the bytes per row).
    xb = x2.astype(jnp.bfloat16)
    out3 = epic_doc_quality(xb, weight, bias)
    out3 = jax.block_until_ready(out3)
    ref3 = epic_doc_quality_ref(xb.astype(jnp.float32), weight, bias)
    assert out3.shape == (B2, 1)
    assert jnp.allclose(out3.astype(jnp.float32), ref3, atol=2e-2), "mismatch vs reference (bf16)"

    print("KERNEL_OK")
</pallas_src>

<mosaic_0001>
module attributes {stable_mosaic.version = 11 : i64} {
  func.func @_epic_doc_quality_kernel(%arg0: i32, %arg1: memref<128x32xf32, #tpu.memory_space<vmem>>, %arg2: memref<32x1xf32, #tpu.memory_space<vmem>>, %arg3: memref<1xf32, #tpu.memory_space<smem>>, %arg4: memref<128x1xf32, #tpu.memory_space<vmem>>) attributes {dimension_semantics = [#tpu.dimension_semantics<parallel>], iteration_bounds = array<i64: 1>, scalar_prefetch = 0 : i64, scratch_operands = 0 : i64, tpu.core_type = #tpu.core_type<tc>, window_params = [{transform_indices = @transform_0, window_bounds = array<i64: 128, 32>}, {pipeline_mode = #tpu.pipeline_mode<synchronous>, transform_indices = @transform_1, window_bounds = array<i64: 32, 1>}, {transform_indices = @transform_2, window_bounds = array<i64: 1>}, {transform_indices = @transform_3, window_bounds = array<i64: 128, 1>}]} {
    %c0 = arith.constant 0 : index
    %c0_0 = arith.constant 0 : index
    %0 = vector.load %arg1[%c0, %c0_0] : memref<128x32xf32, #tpu.memory_space<vmem>>, vector<128x32xf32>
    %c0_1 = arith.constant 0 : index
    %c0_2 = arith.constant 0 : index
    %1 = vector.load %arg2[%c0_1, %c0_2] : memref<32x1xf32, #tpu.memory_space<vmem>>, vector<32x1xf32>
    %cst = arith.constant dense<0.000000e+00> : vector<128x1xf32>
    %2 = tpu.matmul %0, %1, %cst {dimension_numbers = #tpu.dot_dimension_numbers<[1], [0], [0], [1], [0, 0, 1, 1], [], []>} : vector<128x32xf32>, vector<32x1xf32>, vector<128x1xf32> -> vector<128x1xf32>
    %c0_3 = arith.constant 0 : index
    %3 = memref.load %arg3[%c0_3] : memref<1xf32, #tpu.memory_space<smem>>
    %4 = vector.broadcast %3 : f32 to vector<128x1xf32>
    %5 = arith.addf %2, %4 : vector<128x1xf32>
    %cst_4 = arith.constant 0.000000e+00 : f32
    %6 = vector.broadcast %cst_4 : f32 to vector<128x1xf32>
    %7 = arith.subf %6, %5 : vector<128x1xf32>
    %8 = math.exp %7 : vector<128x1xf32>
    %cst_5 = arith.constant 1.000000e+00 : f32
    %9 = vector.broadcast %cst_5 : f32 to vector<128x1xf32>
    %10 = arith.addf %9, %8 : vector<128x1xf32>
    %cst_6 = arith.constant 1.000000e+00 : f32
    %11 = vector.broadcast %cst_6 : f32 to vector<128x1xf32>
    %12 = arith.divf %11, %10 : vector<128x1xf32>
    %c0_7 = arith.constant 0 : index
    %c0_8 = arith.constant 0 : index
    %13 = vector.load %arg4[%c0_7, %c0_8] : memref<128x1xf32, #tpu.memory_space<vmem>>, vector<128x1xf32>
    tpu.vector_store %arg4[%c0_7, %c0_8], %12 {strides = array<i32>} : memref<128x1xf32, #tpu.memory_space<vmem>>, vector<128x1xf32>,
    return
  }
  func.func @transform_0(%arg0: i32) -> (i32, i32) {
    %c0_i32 = arith.constant 0 : i32
    %c0_i32_0 = arith.constant 0 : i32
    return %arg0, %c0_i32 : i32, i32
  }
  func.func @transform_1(%arg0: i32) -> (i32, i32) {
    %c0_i32 = arith.constant 0 : i32
    %c0_i32_0 = arith.constant 0 : i32
    %c0_i32_1 = arith.constant 0 : i32
    return %c0_i32, %c0_i32_0 : i32, i32
  }
  func.func @transform_2(%arg0: i32) -> i32 {
    %c0_i32 = arith.constant 0 : i32
    %c0_i32_0 = arith.constant 0 : i32
    return %c0_i32 : i32
  }
  func.func @transform_3(%arg0: i32) -> (i32, i32) {
    %c0_i32 = arith.constant 0 : i32
    %c0_i32_0 = arith.constant 0 : i32
    return %arg0, %c0_i32 : i32, i32
  }
}

</mosaic_0001>

<bundles_post_ra>
// kernel: tpu_custom_call.1
= control target key start
LH: loop header
LB: loop body
LE: loop exit
PB: predicated region body
PF: predicated region fallthrough
CT: control target
= control target key end

     0   :  { %vm37_vm0 = vcmask 261120   ;;  %vm455_vm2 = vcmask 7168   ;;  %s742_s0 = inlined_call_operand.vmem [shape: f32[16,32], index: 0, kind: input, shape index: {}]   ;;  %s743_s1 = inlined_call_operand.vmem [shape: f32[32,1], index: 1, kind: input, shape index: {}]   ;;  %s744_s2 = inlined_call_operand.<no memory space> [shape: f32[1], index: 2, kind: input, shape index: {}]   ;;  %s745_s3 = inlined_call_operand.vmem [shape: f32[16,1], index: 3, kind: output, shape index: {}]  }
   0x1   :  { %v34_v0 = vld [vmem:[%s743_s1 + $0x18] sm:$0xff]  ;;  %v33_v1 = vld [vmem:[%s743_s1 + $0x10] sm:$0xff]  ;;  %v32_v2 = vld [vmem:[%s743_s1 + $0x8] sm:$0xff]  ;;  %v708_v20 = vstv %s744_s2 }
   0x2   :  { %98 = vmatpush.msra.mxu0 %v34_v0  ;;  %533 = vmatpush.msra.mxu1 %v34_v0  ;;  %v31_v3 = vld [vmem:[%s743_s1] sm:$0xff]  ;;  %v16_v8 = vld [vmem:[%s742_s0 + $0x8] sm:$0xff]  ;;  %v17_v12 = vld [vmem:[%s742_s0 + $0x10] sm:$0xff] }
   0x3   :  { %534 = vmatpush.msra.mxu2 %v34_v0  ;;  %535 = vmatpush.msra.mxu3 %v34_v0  ;;  %v15_v4 = vld [vmem:[%s742_s0] sm:$0xff]  ;;  %v20_v9 = vld [vmem:[%s742_s0 + $0x28] sm:$0xff]  ;;  %v21_v13 = vld [vmem:[%s742_s0 + $0x30] sm:$0xff] }
   0x4   :  { %99 = vmatpush.msra.mxu0 %v33_v1  ;;  %536 = vmatpush.msra.mxu1 %v33_v1  ;;  %v19_v5 = vld [vmem:[%s742_s0 + $0x20] sm:$0xff]  ;;  %v24_v10 = vld [vmem:[%s742_s0 + $0x48] sm:$0xff]  ;;  %v25_v14 = vld [vmem:[%s742_s0 + $0x50] sm:$0xff] }
   0x5   :  { %537 = vmatpush.msra.mxu2 %v33_v1  ;;  %538 = vmatpush.msra.mxu3 %v33_v1  ;;  %v23_v6 = vld [vmem:[%s742_s0 + $0x40] sm:$0xff]  ;;  %v28_v11 = vld [vmem:[%s742_s0 + $0x68] sm:$0xff]  ;;  %v29_v15 = vld [vmem:[%s742_s0 + $0x70] sm:$0xff] }
   0x6   :  { %100 = vmatpush.msra.mxu0 %v32_v2  ;;  %539 = vmatpush.msra.mxu1 %v32_v2  ;;  %v27_v7 = vld [vmem:[%s742_s0 + $0x60] sm:$0xff]  ;;  %v18_v16 = vld [vmem:[%s742_s0 + $0x18] sm:$0xff] }
   0x7   :  { %540 = vmatpush.msra.mxu2 %v32_v2  ;;  %541 = vmatpush.msra.mxu3 %v32_v2  ;;  %v22_v17 = vld [vmem:[%s742_s0 + $0x38] sm:$0xff] }
   0x8   :  { %101 = vmatpush.msra.mxu0 %v31_v3  ;;  %542 = vmatpush.msra.mxu1 %v31_v3  ;;  %v26_v18 = vld [vmem:[%s742_s0 + $0x58] sm:$0xff] }
   0x9   :  { %543 = vmatpush.msra.mxu2 %v31_v3  ;;  %544 = vmatpush.msra.mxu3 %v31_v3  ;;  %v30_v19 = vld [vmem:[%s742_s0 + $0x78] sm:$0xff] }
   0xa   :  { %517 = vmatmul.msk.f32.vlgmr.msra.gmra.mxu0 %vm37_vm0, %v15_v4  ;;  %521 = vmatmul.msk.f32.vlgmr.msra.gmra.mxu1 %vm37_vm0, %v19_v5 }
   0xb   :  { %525 = vmatmul.msk.f32.vlgmr.msra.gmra.mxu2 %vm37_vm0, %v23_v6  ;;  %529 = vmatmul.msk.f32.vlgmr.msra.gmra.mxu3 %vm37_vm0, %v27_v7 }
  0x12   :  { %518 = vmatmul.msk.f32.gmra.mxu0 %vm37_vm0, %v16_v8  ;;  %522 = vmatmul.msk.f32.gmra.mxu1 %vm37_vm0, %v20_v9 }
  0x13   :  { %526 = vmatmul.msk.f32.gmra.mxu2 %vm37_vm0, %v24_v10  ;;  %530 = vmatmul.msk.f32.gmra.mxu3 %vm37_vm0, %v28_v11 }
  0x1a   :  { %519 = vmatmul.msk.f32.gmra.mxu0 %vm37_vm0, %v17_v12  ;;  %523 = vmatmul.msk.f32.gmra.mxu1 %vm37_vm0, %v21_v13 }
  0x1b   :  { %527 = vmatmul.msk.f32.gmra.mxu2 %vm37_vm0, %v25_v14  ;;  %531 = vmatmul.msk.f32.gmra.mxu3 %vm37_vm0, %v29_v15 }
  0x22   :  { %520 = vmatmul.msk.f32.gmra.mxu0 %vm37_vm0, %v18_v16  ;;  %524 = vmatmul.msk.f32.gmra.mxu1 %vm37_vm0, %v22_v17 }
  0x23   :  { %528 = vmatmul.msk.f32.gmra.mxu2 %vm37_vm0, %v26_v18  ;;  %532 = vmatmul.msk.f32.gmra.mxu3 %vm37_vm0, %v30_v19 }
  0x87   :  { %v103_v21 = vpop.f32.mrf.mxu0  ;;  %v115_v22 = vpop.f32.mrf.mxu1 }
  0x88   :  { %v104_v23 = vadd.f32 %v103_v21, %v708_v20  ;;  %v116_v24 = vadd.f32 %v115_v22, %v708_v20 }
  0x8a   :  { %v151_v25 = vsub.f32 0.0, %v104_v23  ;;  %v155_v26 = vsub.f32 0.0, %v116_v24 }
  0x8c   :  { %v167_v27 = vmul.f32 1.442695, %v151_v25  ;;  %v175_v28 = vmul.f32 1.442695, %v155_v26 }
  0x8e   :  { %545 = vpow2.f32 %v167_v27  ;;  %v127_v29 = vpop.f32.mrf.mxu2  ;;  %v139_v30 = vpop.f32.mrf.mxu3 }
  0x8f   :  { %547 = vpow2.f32 %v175_v28  ;;  %v128_v31 = vadd.f32 %v127_v29, %v708_v20  ;;  %v140_v32 = vadd.f32 %v139_v30, %v708_v20  ;;  %v106_v33 = vpop.f32.mrf.mxu0  ;;  %v118_v34 = vpop.f32.mrf.mxu1 }
  0x90   :  { %v107_v35 = vadd.f32 %v106_v33, %v708_v20  ;;  %v119_v36 = vadd.f32 %v118_v34, %v708_v20 }
  0x91   :  { %v159_v37 = vsub.f32 0.0, %v128_v31  ;;  %v163_v38 = vsub.f32 0.0, %v140_v32 }
  0x92   :  { %v152_v39 = vsub.f32 0.0, %v107_v35  ;;  %v156_v40 = vsub.f32 0.0, %v119_v36 }
  0x93   :  { %v183_v41 = vmul.f32 1.442695, %v159_v37  ;;  %v191_v42 = vmul.f32 1.442695, %v163_v38 }
  0x94   :  { %v546_v43 = vpop.eup %545  ;;  %v169_v46 = vmul.f32 1.442695, %v152_v39  ;;  %v177_v48 = vmul.f32 1.442695, %v156_v40 }
  0x95   :  { %v548_v44 = vpop.eup %547  ;;  %v199_v45 = vadd.f32 1.0, %v546_v43  ;;  %549 = vpow2.f32 %v183_v41 }
  0x96   :  { %v203_v47 = vadd.f32 1.0, %v548_v44  ;;  %551 = vpow2.f32 %v191_v42  ;;  %v130_v49 = vpop.f32.mrf.mxu2  ;;  %v142_v51 = vpop.f32.mrf.mxu3 }
  0x97   :  { %553 = vrcp.f32 %v199_v45  ;;  %v131_v50 = vadd.f32 %v130_v49, %v708_v20  ;;  %v224_v52 = vand.u32 2147483647, %v199_v45  ;;  %v109_v53 = vpop.f32.mrf.mxu0  ;;  %v121_v54 = vpop.f32.mrf.mxu1  ;;  %v226_v56 = vand.u32 2147483648, %v199_v45 }
  0x98   :  { %555 = vrcp.f32 %v203_v47  ;;  %v143_v60 = vadd.f32 %v142_v51, %v708_v20  ;;  %vm220_vm1 = vweird.f32 %v199_v45  ;;  %v110_v63 = vadd.f32 %v109_v53, %v708_v20 }
  0x99   :  { %557 = vpow2.f32 %v169_v46  ;;  %v160_v57 = vsub.f32 0.0, %v131_v50  ;;  %v122_v0 = vadd.f32 %v121_v54, %v708_v20  ;;  %vm720_vm3 = vcmp.eq.f32.partialorder %v224_v52, 8.507059e+37 }
  0x9a   :  { %559 = vpow2.f32 %v177_v48  ;;  %v227_v5 = vor.u32 1.1754944e-38, %v226_v56  ;;  %v164_v9 = vsub.f32 0.0, %v143_v60  ;;  %v153_v10 = vsub.f32 0.0, %v110_v63 }
  0x9b   :  { %v550_v55 = vpop.eup %549  ;;  %v185_v6 = vmul.f32 1.442695, %v160_v57  ;;  %v157_v11 = vsub.f32 0.0, %v122_v0 }
  0x9c   :  { %v552_v58 = vpop.eup %551  ;;  %v207_v59 = vadd.f32 1.0, %v550_v55  ;;  %v193_v17 = vmul.f32 1.442695, %v164_v9  ;;  %v171_v27 = vmul.f32 1.442695, %v153_v10 }
  0x9d   :  { %v554_v61 = vpop.eup %553  ;;  %v211_v62 = vadd.f32 1.0, %v552_v58  ;;  %v179_v30 = vmul.f32 1.442695, %v157_v11 }
  0x9e   :  { %v556_v1 = vpop.eup %555  ;;  %v216_v2 = vmul.f32 %v554_v61, %v199_v45  ;;  %561 = vrcp.f32 %v207_v59  ;;  %vm221_vm4 = vweird.f32 %v554_v61  ;;  %v133_v32 = vpop.f32.mrf.mxu2 }
  0x9f   :  { %v558_v4 = vpop.eup %557  ;;  %563 = vrcp.f32 %v211_v62  ;;  %vm222_vm5 = vmor %vm220_vm1, %vm221_vm4  ;;  %v145_v33 = vpop.f32.mrf.mxu3  ;;  %v134_v39 = vadd.f32 %v133_v32, %v708_v20 }
  0xa0   :  { %v560_v7 = vpop.eup %559  ;;  %v217_v8 = vsub.f32 1.0, %v216_v2  ;;  %v200_v13 = vadd.f32 1.0, %v558_v4  ;;  %565 = vpow2.f32 %v185_v6  ;;  %v146_v40 = vadd.f32 %v145_v33, %v708_v20  ;;  %v112_v43 = vpop.f32.mrf.mxu0 }
  0xa1   :  { %v204_v14 = vadd.f32 1.0, %v560_v7  ;;  %v161_v46 = vsub.f32 0.0, %v134_v39  ;;  %v113_v49 = vadd.f32 %v112_v43, %v708_v20  ;;  %v124_v52 = vpop.f32.mrf.mxu1 }
  0xa2   :  { %v218_v12 = vmul.f32 %v554_v61, %v217_v8  ;;  %567 = vrcp.f32 %v200_v13  ;;  %vm235_vm6 = vweird.f32 %v200_v13  ;;  %v239_v24 = vand.u32 2147483647, %v200_v13 }
  0xa3   :  { %569 = vrcp.f32 %v204_v14  ;;  %v241_v29 = vand.u32 2147483648, %v200_v13  ;;  %v165_v48 = vsub.f32 0.0, %v146_v40  ;;  %v187_v54 = vmul.f32 1.442695, %v161_v46 }
  0xa4   :  { %v562_v15 = vpop.eup %561  ;;  %v219_v16 = vadd.f32 %v554_v61, %v218_v12  ;;  %571 = vpow2.f32 %v193_v17  ;;  %vm240_vm9 = vcmp.eq.f32.partialorder %v239_v24, 8.507059e+37  ;;  %v154_v57 = vsub.f32 0.0, %v113_v49 }
  0xa5   :  { %v564_v18 = vpop.eup %563  ;;  %v242_v42 = vor.u32 1.1754944e-38, %v241_v29  ;;  %v195_v56 = vmul.f32 1.442695, %v165_v48  ;;  %v125_v58 = vadd.f32 %v124_v52, %v708_v20 }
  0xa6   :  { %v223_v19 = vsel %vm222_vm5, %v554_v61, %v219_v16  ;;  %v566_v22 = vpop.eup %565  ;;  %v136_v59 = vpop.f32.mrf.mxu2  ;;  %v173_v62 = vmul.f32 1.442695, %v154_v57 }
  0xa7   :  { %v228_v21 = vsel %vm720_vm3, %v227_v5, %v223_v19  ;;  %v208_v25 = vadd.f32 1.0, %v566_v22  ;;  %v148_v60 = vpop.f32.mrf.mxu3  ;;  %v158_v63 = vsub.f32 0.0, %v125_v58  ;;  %v137_v0 = vadd.f32 %v136_v59, %v708_v20 }
  0xa8   :  { %456 = vst.msk [vmem:[#allocation3] sm:$0xff] %vm455_vm2, %v228_v21  ;;  %v568_v23 = vpop.eup %567  ;;  %v149_v2 = vadd.f32 %v148_v60, %v708_v20 }
  0xa9   :  { %v231_v26 = vmul.f32 %v568_v23, %v200_v13  ;;  %v570_v28 = vpop.eup %569  ;;  %573 = vrcp.f32 %v208_v25  ;;  %vm236_vm7 = vweird.f32 %v568_v23  ;;  %v181_v4 = vmul.f32 1.442695, %v158_v63 }
  0xaa   :  { %v572_v34 = vpop.eup %571  ;;  %575 = vpow2.f32 %v171_v27  ;;  %vm237_vm8 = vmor %vm235_vm6, %vm236_vm7  ;;  %v162_v5 = vsub.f32 0.0, %v137_v0  ;;  %v166_v9 = vsub.f32 0.0, %v149_v2 }
  0xab   :  { %v232_v31 = vsub.f32 1.0, %v231_v26  ;;  %v212_v37 = vadd.f32 1.0, %v572_v34  ;;  %577 = vpow2.f32 %v179_v30 }
  0xac   :  { %v189_v11 = vmul.f32 1.442695, %v162_v5  ;;  %v197_v13 = vmul.f32 1.442695, %v166_v9 }
  0xad   :  { %v233_v36 = vmul.f32 %v568_v23, %v232_v31  ;;  %579 = vrcp.f32 %v212_v37 }
  0xaf   :  { %v504_v35 = vld [vmem:[#allocation3] sm:$0xff]  ;;  %v234_v38 = vadd.f32 %v568_v23, %v233_v36  ;;  %v574_v41 = vpop.eup %573 }
  0xb0   :  { %505 = vst [vmem:[%s745_s3] sm:$0xff] %v504_v35  ;;  %v576_v47 = vpop.eup %575 }
  0xb1   :  { %v238_v44 = vsel %vm237_vm8, %v568_v23, %v234_v38  ;;  %v578_v50 = vpop.eup %577  ;;  %v201_v51 = vadd.f32 1.0, %v576_v47 }
  0xb2   :  { %v243_v45 = vsel %vm240_vm9, %v242_v42, %v238_v44  ;;  %v205_v53 = vadd.f32 1.0, %v578_v50 }
  0xb3   :  { %457 = vst.msk [vmem:[#allocation3 + $0x8] sm:$0xff] %vm455_vm2, %v243_v45  ;;  %v580_v55 = vpop.eup %579  ;;  %581 = vrcp.f32 %v201_v51 }
  0xb4   :  { %583 = vrcp.f32 %v205_v53 }
  0xb5   :  { %585 = vpow2.f32 %v187_v54 }
  0xb6   :  { %587 = vpow2.f32 %v195_v56 }
  0xb7   :  { %589 = vpow2.f32 %v173_v62 }
  0xb8   :  { %591 = vpow2.f32 %v181_v4 }
  0xb9   :  { %v582_v1 = vpop.eup %581 }
  0xba   :  { %v506_v61 = vld [vmem:[#allocation3 + $0x8] sm:$0xff]  ;;  %v584_v3 = vpop.eup %583 }
  0xbb   :  { %507 = vst [vmem:[%s745_s3 + $0x8] sm:$0xff] %v506_v61  ;;  %v586_v6 = vpop.eup %585 }
  0xbc   :  { %v588_v7 = vpop.eup %587  ;;  %v209_v8 = vadd.f32 1.0, %v586_v6 }
  0xbd   :  { %v213_v10 = vadd.f32 1.0, %v588_v7  ;;  %v590_v12 = vpop.eup %589 }
  0xbe   :  { %593 = vrcp.f32 %v209_v8  ;;  %v592_v14 = vpop.eup %591  ;;  %v202_v15 = vadd.f32 1.0, %v590_v12 }
  0xbf   :  { %595 = vrcp.f32 %v213_v10  ;;  %v206_v20 = vadd.f32 1.0, %v592_v14 }
  0xc0   :  { %597 = vpow2.f32 %v189_v11 }
  0xc1   :  { %599 = vrcp.f32 %v202_v15 }
  0xc2   :  { %601 = vpow2.f32 %v197_v13 }
  0xc3   :  { %603 = vrcp.f32 %v206_v20 }
  0xc4   :  { %v594_v16 = vpop.eup %593 }
  0xc5   :  { %v596_v17 = vpop.eup %595 }
  0xc6   :  { %v598_v18 = vpop.eup %597 }
  0xc7   :  { %v210_v19 = vadd.f32 1.0, %v598_v18  ;;  %v600_v21 = vpop.eup %599 }
  0xc8   :  { %v602_v22 = vpop.eup %601 }
  0xc9   :  { %605 = vrcp.f32 %v210_v19  ;;  %v604_v23 = vpop.eup %603  ;;  %v214_v24 = vadd.f32 1.0, %v602_v22 }
  0xcb   :  { %607 = vrcp.f32 %v214_v24 }
  0xcf   :  { %v606_v25 = vpop.eup %605 }
  0xd1   :  { %v608_v26 = vpop.eup %607 }

</bundles_post_ra>
